<compile_context>
chip_gen: v5e
topology: v5e:2x2
jax: 0.10.0
libtpu: 0.0.40
codegen_flags: <defaults>
</compile_context>

<pallas_src>
import functools
import math

import jax
import jax.numpy as jnp
from jax import lax
from jax.experimental import pallas as pl
from jax.experimental.pallas import tpu as pltpu

_P = lax.Precision.HIGHEST  # used only by the pure-JAX reference


def cma_kernel(gamma_ref, wq_ref, wk_ref, wv_ref, bq_ref, bk_ref, bv_ref,
               x_ref, y_ref, o_ref, k_scr, v_scr, *, n_valid, need_mask):
    qi = pl.program_id(1)

    # K / V depend only on y[b]: compute once per batch element (first query
    # tile) and cache in VMEM scratch for all later query tiles.
    @pl.when(qi == 0)
    def _():
        yb = y_ref[0]                                                # (C, Np) bf16
        k = jnp.dot(wk_ref[...], yb,
                    preferred_element_type=jnp.float32) + bk_ref[...]   # (Cr, Np)
        k_scr[...] = k.astype(jnp.bfloat16)
        v = jnp.dot(wv_ref[...], yb,
                    preferred_element_type=jnp.float32) + bv_ref[...]   # (C, Np)
        # Store V transposed (Np, C): one per-batch XLU transpose so that the
        # per-tile P@V matmul below is a canonical (M,K)@(K,N) MXU op.
        v_scr[...] = v.T.astype(jnp.bfloat16)

    xb = x_ref[0]                                                    # (C, TQ)
    q = jnp.dot(wq_ref[...], xb.astype(jnp.bfloat16),
                preferred_element_type=jnp.float32) + bq_ref[...]    # (Cr, TQ)

    # energy[i, j] = sum_o q[o, i] k[o, j].  The big operand K stays in the
    # canonical RHS (sublane-contracted) position; only the small (Cr, TQ) q
    # sits in the transposed-LHS slot.
    energy = lax.dot_general(q.astype(jnp.bfloat16), k_scr[...],
                             (((0,), (0,)), ((), ())),
                             preferred_element_type=jnp.float32)     # (TQ, Np)
    if need_mask:
        key_idx = lax.broadcasted_iota(jnp.int32, energy.shape, 1)
        energy = jnp.where(key_idx < n_valid, energy, jnp.float32(-1e30))

    # Softmax over keys with deferred normalization.
    m = jnp.max(energy, axis=-1, keepdims=True)
    p = jnp.exp(energy - m)
    l = jnp.sum(p, axis=-1, keepdims=True)                           # (TQ, 1)

    # out[i, c] = sum_j p[i, j] V[j, c] — canonical (TQ,Np)@(Np,C) on the MXU,
    # bf16 operands with f32 accumulation.
    out = jnp.dot(p.astype(jnp.bfloat16), v_scr[...],
                  preferred_element_type=jnp.float32)                # (TQ, C)
    out = out * pl.reciprocal(l, approx=True)                        # deferred 1/l

    # Small (TQ, C) -> (C, TQ) transpose, then fused gamma scale + residual.
    o_ref[0] = (gamma_ref[0] * out.T + xb.astype(jnp.float32)).astype(o_ref.dtype)


def _vmem_plan():
    """Returns (max query-tile size, scoped-VMEM limit) for this TPU generation."""
    mib = 1024 * 1024
    try:
        cap = int(pltpu.get_tpu_info().vmem_capacity_bytes)
        if cap <= 80 * mib:                       # v7x-class: 64 MiB per TensorCore
            return 256, min(56 * mib, cap - 8 * mib)
        return 512, 96 * mib                      # v5e / v6e: 128 MiB physical
    except Exception:                             # unknown chip: stay conservative
        return 256, None


def _pick_tq(n_padded, max_tq):
    """Largest multiple of 128 that divides the padded N and is <= max_tq."""
    tq = min(max_tq, n_padded)
    while n_padded % tq:
        tq -= 128
    return tq


def cross_modal_attention(x, y, wq, bq, wk, bk, wv, bv, gamma):
    """x, y: (B, C, H, W). wq/wk: (C//r, C, 1, 1), wv: (C, C, 1, 1).
    bq/bk: (C//r,), bv: (C,), gamma: scalar. Returns (B, C, H, W)."""
    B, C, H, W = x.shape
    N = H * W
    Cr = wq.shape[0]
    Np = ((N + 127) // 128) * 128                 # lane-dense padded key/query count
    max_tq, vmem_limit = _vmem_plan()
    tq = _pick_tq(Np, max_tq)

    xf = x.reshape(B, C, N)
    yf = y.reshape(B, C, N)
    if Np != N:
        xf = jnp.pad(xf, ((0, 0), (0, 0), (0, Np - N)))
        yf = jnp.pad(yf, ((0, 0), (0, 0), (0, Np - N)))
    yf = yf.astype(jnp.bfloat16)                  # y only feeds bf16 MXU matmuls

    wq2 = wq.reshape(Cr, C).astype(jnp.bfloat16)
    wk2 = wk.reshape(Cr, C).astype(jnp.bfloat16)
    wv2 = wv.reshape(C, C).astype(jnp.bfloat16)
    bq2 = bq.reshape(Cr, 1).astype(jnp.float32)
    bk2 = bk.reshape(Cr, 1).astype(jnp.float32)
    bv2 = bv.reshape(C, 1).astype(jnp.float32)
    gamma_arr = jnp.asarray(gamma, jnp.float32).reshape(1)

    kernel = functools.partial(cma_kernel, n_valid=N, need_mask=(Np != N))

    cp_kwargs = dict(dimension_semantics=("parallel", "arbitrary"))
    if vmem_limit is not None:
        cp_kwargs["vmem_limit_bytes"] = int(vmem_limit)

    out_flat = pl.pallas_call(
        kernel,
        out_shape=jax.ShapeDtypeStruct((B, C, Np), x.dtype),
        grid=(B, Np // tq),
        in_specs=[
            pl.BlockSpec(memory_space=pltpu.MemorySpace.SMEM),     # gamma (scalar)
            pl.BlockSpec((Cr, C), lambda b, q: (0, 0)),            # Wq (bf16)
            pl.BlockSpec((Cr, C), lambda b, q: (0, 0)),            # Wk (bf16)
            pl.BlockSpec((C, C),  lambda b, q: (0, 0)),            # Wv (bf16)
            pl.BlockSpec((Cr, 1), lambda b, q: (0, 0)),            # bq
            pl.BlockSpec((Cr, 1), lambda b, q: (0, 0)),            # bk
            pl.BlockSpec((C, 1),  lambda b, q: (0, 0)),            # bv
            pl.BlockSpec((1, C, tq), lambda b, q: (b, 0, q)),      # x query tile
            pl.BlockSpec((1, C, Np), lambda b, q: (b, 0, 0)),      # y (full per batch)
        ],
        out_specs=pl.BlockSpec((1, C, tq), lambda b, q: (b, 0, q)),
        scratch_shapes=[
            pltpu.VMEM((Cr, Np), jnp.bfloat16),   # cached K for current batch elem
            pltpu.VMEM((Np, C), jnp.bfloat16),    # cached V^T for current batch elem
        ],
        compiler_params=pltpu.CompilerParams(**cp_kwargs),
    )(gamma_arr, wq2, wk2, wv2, bq2, bk2, bv2, xf, yf)

    return out_flat[:, :, :N].reshape(B, C, H, W)


def reference(x, y, wq, bq, wk, bk, wv, bv, gamma):
    """Pure-JAX f32 reference matching the PyTorch forward exactly."""
    B, C, H, W = x.shape
    N = H * W
    xf = x.reshape(B, C, N)
    yf = y.reshape(B, C, N)
    wq2 = wq.reshape(wq.shape[0], C)
    wk2 = wk.reshape(wk.shape[0], C)
    wv2 = wv.reshape(C, C)
    q = jnp.einsum("oc,bcn->bon", wq2, xf, precision=_P) + bq[None, :, None]
    k = jnp.einsum("oc,bcn->bon", wk2, yf, precision=_P) + bk[None, :, None]
    v = jnp.einsum("oc,bcn->bon", wv2, yf, precision=_P) + bv[None, :, None]
    energy = jnp.einsum("boi,boj->bij", q, k, precision=_P)          # (B, N, N)
    attn = jax.nn.softmax(energy, axis=-1)
    out = jnp.einsum("bcj,bij->bci", v, attn, precision=_P)          # (B, C, N)
    return (gamma * out + xf).reshape(B, C, H, W)


if __name__ == "__main__":
    def xavier_normal(k, shape, gain=0.02):
        fan_out = shape[0] * shape[2] * shape[3]
        fan_in = shape[1] * shape[2] * shape[3]
        std = gain * math.sqrt(2.0 / (fan_in + fan_out))
        return std * jax.random.normal(k, shape, dtype=jnp.float32)

    key = jax.random.PRNGKey(0)
    ratio = 8
    # First case exercises N-padding + key masking (N=64 -> 128); second case
    # exercises multiple query tiles reusing the per-batch cached K/V scratch.
    for (B, C, H, W) in [(2, 32, 8, 8), (2, 32, 32, 32)]:
        Cr = C // ratio
        key, kx, ky, kq, kk, kv, kbq, kbk, kbv = jax.random.split(key, 9)

        x = jax.random.normal(kx, (B, C, H, W), dtype=jnp.float32)
        y = jax.random.normal(ky, (B, C, H, W), dtype=jnp.float32)
        wq = xavier_normal(kq, (Cr, C, 1, 1))
        wk = xavier_normal(kk, (Cr, C, 1, 1))
        wv = xavier_normal(kv, (C, C, 1, 1))
        # Conv2d default bias init: U(-1/sqrt(fan_in), 1/sqrt(fan_in))
        bq = jax.random.uniform(kbq, (Cr,), jnp.float32, -1.0, 1.0) / math.sqrt(C)
        bk = jax.random.uniform(kbk, (Cr,), jnp.float32, -1.0, 1.0) / math.sqrt(C)
        bv = jax.random.uniform(kbv, (C,), jnp.float32, -1.0, 1.0) / math.sqrt(C)
        # PyTorch initializes gamma to 0 (output == x); use a nonzero value so
        # the attention path is actually exercised by the correctness check.
        gamma = jnp.float32(0.5)

        out = jax.block_until_ready(
            cross_modal_attention(x, y, wq, bq, wk, bk, wv, bv, gamma))
        ref = reference(x, y, wq, bq, wk, bk, wv, bv, gamma)
        assert out.shape == (B, C, H, W)
        # bf16 MXU operands + approx reciprocal vs the f32 HIGHEST reference.
        assert jnp.allclose(out, ref, rtol=2e-2, atol=2e-2), "mismatch vs reference"

    # TODO(synk): optional self.activation (default None in the module) is not applied.
    print("KERNEL_OK")
</pallas_src>

<mosaic_0001>
module attributes {stable_mosaic.version = 11 : i64} {
  func.func @cma_kernel(%arg0: i32, %arg1: i32, %arg2: memref<1xf32, #tpu.memory_space<smem>>, %arg3: memref<4x32xbf16, #tpu.memory_space<vmem>>, %arg4: memref<4x32xbf16, #tpu.memory_space<vmem>>, %arg5: memref<32x32xbf16, #tpu.memory_space<vmem>>, %arg6: memref<4x1xf32, #tpu.memory_space<vmem>>, %arg7: memref<4x1xf32, #tpu.memory_space<vmem>>, %arg8: memref<32x1xf32, #tpu.memory_space<vmem>>, %arg9: memref<1x32x128xf32, #tpu.memory_space<vmem>>, %arg10: memref<1x32x128xbf16, #tpu.memory_space<vmem>>, %arg11: memref<1x32x128xf32, #tpu.memory_space<vmem>>, %arg12: memref<4x128xbf16, #tpu.memory_space<vmem>>, %arg13: memref<128x32xbf16, #tpu.memory_space<vmem>>) attributes {dimension_semantics = [#tpu.dimension_semantics<parallel>, #tpu.dimension_semantics<arbitrary>], iteration_bounds = array<i64: 2, 1>, scalar_prefetch = 0 : i64, scratch_operands = 2 : i64, tpu.core_type = #tpu.core_type<tc>, window_params = [{transform_indices = @transform_0, window_bounds = array<i64: 1>}, {pipeline_mode = #tpu.pipeline_mode<synchronous>, transform_indices = @transform_1, window_bounds = array<i64: 4, 32>}, {pipeline_mode = #tpu.pipeline_mode<synchronous>, transform_indices = @transform_2, window_bounds = array<i64: 4, 32>}, {pipeline_mode = #tpu.pipeline_mode<synchronous>, transform_indices = @transform_3, window_bounds = array<i64: 32, 32>}, {pipeline_mode = #tpu.pipeline_mode<synchronous>, transform_indices = @transform_4, window_bounds = array<i64: 4, 1>}, {pipeline_mode = #tpu.pipeline_mode<synchronous>, transform_indices = @transform_5, window_bounds = array<i64: 4, 1>}, {pipeline_mode = #tpu.pipeline_mode<synchronous>, transform_indices = @transform_6, window_bounds = array<i64: 32, 1>}, {transform_indices = @transform_7, window_bounds = array<i64: 1, 32, 128>}, {transform_indices = @transform_8, window_bounds = array<i64: 1, 32, 128>}, {transform_indices = @transform_9, window_bounds = array<i64: 1, 32, 128>}]} {
    %c0_i32 = arith.constant 0 : i32
    %0 = arith.cmpi eq, %arg1, %c0_i32 : i32
    %1 = arith.extui %0 : i1 to i32
    %c0_i32_0 = arith.constant 0 : i32
    %2 = arith.cmpi ne, %1, %c0_i32_0 : i32
    scf.if %2 {
      %c0_20 = arith.constant 0 : index
      %c0_21 = arith.constant 0 : index
      %c0_22 = arith.constant 0 : index
      %40 = vector.load %arg10[%c0_20, %c0_21, %c0_22] : memref<1x32x128xbf16, #tpu.memory_space<vmem>>, vector<1x32x128xbf16>
      %41 = vector.shape_cast %40 : vector<1x32x128xbf16> to vector<32x128xbf16>
      %c0_23 = arith.constant 0 : index
      %c0_24 = arith.constant 0 : index
      %42 = vector.load %arg4[%c0_23, %c0_24] : memref<4x32xbf16, #tpu.memory_space<vmem>>, vector<4x32xbf16>
      %cst_25 = arith.constant dense<0.000000e+00> : vector<4x128xf32>
      %43 = tpu.matmul %42, %41, %cst_25 {dimension_numbers = #tpu.dot_dimension_numbers<[1], [0], [0], [1], [0, 0, 1, 1], [], []>} : vector<4x32xbf16>, vector<32x128xbf16>, vector<4x128xf32> -> vector<4x128xf32>
      %c0_26 = arith.constant 0 : index
      %c0_27 = arith.constant 0 : index
      %44 = vector.load %arg7[%c0_26, %c0_27] : memref<4x1xf32, #tpu.memory_space<vmem>>, vector<4x1xf32>
      %45 = vector.broadcast %44 : vector<4x1xf32> to vector<4x128xf32>
      %46 = arith.addf %43, %45 : vector<4x128xf32>
      %47 = arith.truncf %46 : vector<4x128xf32> to vector<4x128xbf16>
      %c0_28 = arith.constant 0 : index
      %c0_29 = arith.constant 0 : index
      %48 = vector.load %arg12[%c0_28, %c0_29] : memref<4x128xbf16, #tpu.memory_space<vmem>>, vector<4x128xbf16>
      tpu.vector_store %arg12[%c0_28, %c0_29], %47 {strides = array<i32>} : memref<4x128xbf16, #tpu.memory_space<vmem>>, vector<4x128xbf16>,
      %c0_30 = arith.constant 0 : index
      %c0_31 = arith.constant 0 : index
      %49 = vector.load %arg5[%c0_30, %c0_31] : memref<32x32xbf16, #tpu.memory_space<vmem>>, vector<32x32xbf16>
      %cst_32 = arith.constant dense<0.000000e+00> : vector<32x128xf32>
      %50 = tpu.matmul %49, %41, %cst_32 {dimension_numbers = #tpu.dot_dimension_numbers<[1], [0], [0], [1], [0, 0, 1, 1], [], []>} : vector<32x32xbf16>, vector<32x128xbf16>, vector<32x128xf32> -> vector<32x128xf32>
      %c0_33 = arith.constant 0 : index
      %c0_34 = arith.constant 0 : index
      %51 = vector.load %arg8[%c0_33, %c0_34] : memref<32x1xf32, #tpu.memory_space<vmem>>, vector<32x1xf32>
      %52 = vector.broadcast %51 : vector<32x1xf32> to vector<32x128xf32>
      %53 = arith.addf %50, %52 : vector<32x128xf32>
      %54 = tpu.transpose %53, [1, 0] : vector<32x128xf32> -> vector<128x32xf32>
      %55 = arith.truncf %54 : vector<128x32xf32> to vector<128x32xbf16>
      %c0_35 = arith.constant 0 : index
      %c0_36 = arith.constant 0 : index
      %56 = vector.load %arg13[%c0_35, %c0_36] : memref<128x32xbf16, #tpu.memory_space<vmem>>, vector<128x32xbf16>
      tpu.vector_store %arg13[%c0_35, %c0_36], %55 {strides = array<i32>} : memref<128x32xbf16, #tpu.memory_space<vmem>>, vector<128x32xbf16>,
    } else {
    }
    %c0 = arith.constant 0 : index
    %c0_1 = arith.constant 0 : index
    %c0_2 = arith.constant 0 : index
    %3 = vector.load %arg9[%c0, %c0_1, %c0_2] : memref<1x32x128xf32, #tpu.memory_space<vmem>>, vector<1x32x128xf32>
    %4 = vector.shape_cast %3 : vector<1x32x128xf32> to vector<32x128xf32>
    %c0_3 = arith.constant 0 : index
    %c0_4 = arith.constant 0 : index
    %5 = vector.load %arg3[%c0_3, %c0_4] : memref<4x32xbf16, #tpu.memory_space<vmem>>, vector<4x32xbf16>
    %6 = arith.truncf %4 : vector<32x128xf32> to vector<32x128xbf16>
    %cst = arith.constant dense<0.000000e+00> : vector<4x128xf32>
    %7 = tpu.matmul %5, %6, %cst {dimension_numbers = #tpu.dot_dimension_numbers<[1], [0], [0], [1], [0, 0, 1, 1], [], []>} : vector<4x32xbf16>, vector<32x128xbf16>, vector<4x128xf32> -> vector<4x128xf32>
    %c0_5 = arith.constant 0 : index
    %c0_6 = arith.constant 0 : index
    %8 = vector.load %arg6[%c0_5, %c0_6] : memref<4x1xf32, #tpu.memory_space<vmem>>, vector<4x1xf32>
    %9 = vector.broadcast %8 : vector<4x1xf32> to vector<4x128xf32>
    %10 = arith.addf %7, %9 : vector<4x128xf32>
    %11 = arith.truncf %10 : vector<4x128xf32> to vector<4x128xbf16>
    %c0_7 = arith.constant 0 : index
    %c0_8 = arith.constant 0 : index
    %12 = vector.load %arg12[%c0_7, %c0_8] : memref<4x128xbf16, #tpu.memory_space<vmem>>, vector<4x128xbf16>
    %cst_9 = arith.constant dense<0.000000e+00> : vector<128x128xf32>
    %13 = tpu.matmul %11, %12, %cst_9 {dimension_numbers = #tpu.dot_dimension_numbers<[0], [0], [1], [1], [0, 1, 1, 1], [], []>} : vector<4x128xbf16>, vector<4x128xbf16>, vector<128x128xf32> -> vector<128x128xf32>
    %14 = tpu.iota {dimensions = array<i32: 1>} : vector<128x128xi32>
    %c64_i32 = arith.constant 64 : i32
    %15 = vector.broadcast %c64_i32 : i32 to vector<128x128xi32>
    %16 = arith.cmpi slt, %14, %15 : vector<128x128xi32>
    %cst_10 = arith.constant -1.000000e+30 : f32
    %17 = vector.broadcast %cst_10 : f32 to vector<128x128xf32>
    %18 = arith.select %16, %13, %17 : vector<128x128xi1>, vector<128x128xf32>
    %cst_11 = arith.constant dense<0xFF800000> : vector<128xf32>
    %19 = vector.multi_reduction <maximumf>, %18, %cst_11 [1] : vector<128x128xf32> to vector<128xf32>
    %20 = vector.shape_cast %19 : vector<128xf32> to vector<128x1xf32>
    %21 = vector.broadcast %20 : vector<128x1xf32> to vector<128x128xf32>
    %22 = arith.subf %18, %21 : vector<128x128xf32>
    %23 = math.exp %22 : vector<128x128xf32>
    %cst_12 = arith.constant dense<0.000000e+00> : vector<128xf32>
    %24 = vector.multi_reduction <add>, %23, %cst_12 [1] : vector<128x128xf32> to vector<128xf32>
    %25 = vector.shape_cast %24 : vector<128xf32> to vector<128x1xf32>
    %26 = arith.truncf %23 : vector<128x128xf32> to vector<128x128xbf16>
    %c0_13 = arith.constant 0 : index
    %c0_14 = arith.constant 0 : index
    %27 = vector.load %arg13[%c0_13, %c0_14] : memref<128x32xbf16, #tpu.memory_space<vmem>>, vector<128x32xbf16>
    %cst_15 = arith.constant dense<0.000000e+00> : vector<128x32xf32>
    %28 = tpu.matmul %26, %27, %cst_15 {dimension_numbers = #tpu.dot_dimension_numbers<[1], [0], [0], [1], [0, 0, 1, 1], [], []>} : vector<128x128xbf16>, vector<128x32xbf16>, vector<128x32xf32> -> vector<128x32xf32>
    %29 = tpu.reciprocal %25 {approx = true} : vector<128x1xf32> -> vector<128x1xf32>
    %30 = vector.broadcast %29 : vector<128x1xf32> to vector<128x32xf32>
    %31 = arith.mulf %28, %30 : vector<128x32xf32>
    %c0_16 = arith.constant 0 : index
    %32 = memref.load %arg2[%c0_16] : memref<1xf32, #tpu.memory_space<smem>>
    %33 = tpu.transpose %31, [1, 0] : vector<128x32xf32> -> vector<32x128xf32>
    %34 = vector.broadcast %32 : f32 to vector<32x128xf32>
    %35 = arith.mulf %34, %33 : vector<32x128xf32>
    %36 = arith.addf %35, %4 : vector<32x128xf32>
    %c0_17 = arith.constant 0 : index
    %c0_18 = arith.constant 0 : index
    %c0_19 = arith.constant 0 : index
    %37 = vector.load %arg11[%c0_17, %c0_18, %c0_19] : memref<1x32x128xf32, #tpu.memory_space<vmem>>, vector<1x32x128xf32>
    %38 = vector.shape_cast %37 : vector<1x32x128xf32> to vector<32x128xf32>
    %39 = vector.shape_cast %36 : vector<32x128xf32> to vector<1x32x128xf32>
    tpu.vector_store %arg11[%c0_17, %c0_18, %c0_19], %39 {strides = array<i32>} : memref<1x32x128xf32, #tpu.memory_space<vmem>>, vector<1x32x128xf32>,
    return
  }
  func.func @transform_0(%arg0: i32, %arg1: i32) -> i32 {
    %c0_i32 = arith.constant 0 : i32
    %c0_i32_0 = arith.constant 0 : i32
    return %c0_i32 : i32
  }
  func.func @transform_1(%arg0: i32, %arg1: i32) -> (i32, i32) {
    %c0_i32 = arith.constant 0 : i32
    %c0_i32_0 = arith.constant 0 : i32
    %c0_i32_1 = arith.constant 0 : i32
    return %c0_i32, %c0_i32_0 : i32, i32
  }
  func.func @transform_2(%arg0: i32, %arg1: i32) -> (i32, i32) {
    %c0_i32 = arith.constant 0 : i32
    %c0_i32_0 = arith.constant 0 : i32
    %c0_i32_1 = arith.constant 0 : i32
    return %c0_i32, %c0_i32_0 : i32, i32
  }
  func.func @transform_3(%arg0: i32, %arg1: i32) -> (i32, i32) {
    %c0_i32 = arith.constant 0 : i32
    %c0_i32_0 = arith.constant 0 : i32
    %c0_i32_1 = arith.constant 0 : i32
    return %c0_i32, %c0_i32_0 : i32, i32
  }
  func.func @transform_4(%arg0: i32, %arg1: i32) -> (i32, i32) {
    %c0_i32 = arith.constant 0 : i32
    %c0_i32_0 = arith.constant 0 : i32
    %c0_i32_1 = arith.constant 0 : i32
    return %c0_i32, %c0_i32_0 : i32, i32
  }
  func.func @transform_5(%arg0: i32, %arg1: i32) -> (i32, i32) {
    %c0_i32 = arith.constant 0 : i32
    %c0_i32_0 = arith.constant 0 : i32
    %c0_i32_1 = arith.constant 0 : i32
    return %c0_i32, %c0_i32_0 : i32, i32
  }
  func.func @transform_6(%arg0: i32, %arg1: i32) -> (i32, i32) {
    %c0_i32 = arith.constant 0 : i32
    %c0_i32_0 = arith.constant 0 : i32
    %c0_i32_1 = arith.constant 0 : i32
    return %c0_i32, %c0_i32_0 : i32, i32
  }
  func.func @transform_7(%arg0: i32, %arg1: i32) -> (i32, i32, i32) {
    %c0_i32 = arith.constant 0 : i32
    %c0_i32_0 = arith.constant 0 : i32
    return %arg0, %c0_i32, %arg1 : i32, i32, i32
  }
  func.func @transform_8(%arg0: i32, %arg1: i32) -> (i32, i32, i32) {
    %c0_i32 = arith.constant 0 : i32
    %c0_i32_0 = arith.constant 0 : i32
    %c0_i32_1 = arith.constant 0 : i32
    return %arg0, %c0_i32, %c0_i32_0 : i32, i32, i32
  }
  func.func @transform_9(%arg0: i32, %arg1: i32) -> (i32, i32, i32) {
    %c0_i32 = arith.constant 0 : i32
    %c0_i32_0 = arith.constant 0 : i32
    return %arg0, %c0_i32, %arg1 : i32, i32, i32
  }
}

</mosaic_0001>

<bundles_post_ra>
// kernel: tpu_custom_call.1
= control target key start
LH: loop header
LB: loop body
LE: loop exit
PB: predicated region body
PF: predicated region fallthrough
CT: control target
= control target key end

     0   :  { %s1998_s0 = inlined_call_operand.<no memory space> [shape: f32[1], index: 0, kind: input, shape index: {}]   ;;  %s1999_s1 = inlined_call_operand.vmem [shape: bf16[4,32], index: 1, kind: input, shape index: {}]   ;;  %s2000_s2 = inlined_call_operand.vmem [shape: bf16[4,32], index: 2, kind: input, shape index: {}]   ;;  %s2001_s3 = inlined_call_operand.hbm [shape: bf16[32,32], index: 3, kind: input, shape index: {}]   ;;  %s2002_s4 = inlined_call_operand.vmem [shape: f32[4,1], index: 4, kind: input, shape index: {}]   ;;  %s2003_s5 = inlined_call_operand.vmem [shape: f32[4,1], index: 5, kind: input, shape index: {}]   ;;  %s2004_s6 = inlined_call_operand.vmem [shape: f32[32,1], index: 6, kind: input, shape index: {}]   ;;  %s2005_s7 = inlined_call_operand.hbm [shape: f32[2,32,128], index: 7, kind: input, shape index: {}]   ;;  %s2006_s8 = inlined_call_operand.vmem [shape: bf16[2,32,128], index: 8, kind: input, shape index: {}]   ;;  %s2007_s9 = inlined_call_operand.hbm [shape: f32[2,32,128], index: 9, kind: output, shape index: {}]  }
   0x1   :  { %2015 = sst [smem:[#allocation19_spill]] %s2001_s3 }
   0x2   :  { %14 = sst [smem:[#allocation4]] %s1998_s0 }
   0x3   :  { %15 = vsyncpa [#allocation6], 0 }
   0x4   :  { %16 = vsyncpa [#allocation9], 0 }
   0x5   :  { %18 = vsyncpa [#allocation9 + $0x1], 0 }
   0x6   :  { %19 = vsyncpa [#allocation7], 0 }
   0x7   :  { %21 = vsyncpa [#allocation7 + $0x1], 0  ;;  %s1625_s11 = smov 0   ;;  %s1627_s12 = smov 0  }
   0x8   :  { %s1629_s13 = smov 0   ;;  %s1631_s14 = smov 0  }
   0x9   :  { %s1633_s15 = smov 0   ;;  %s1635_s16 = smov 0  }
   0xa LB: > { %2016 = sst [smem:[#allocation14_spill]] %s1542_s11  ;;  %s1165_s0 = sadd.s32 4294967295, %s1562_s16   ;;  %s1562_s16 = sphi %s1635_s16, %s27_s16   ;;  %s1558_s15 = sphi %s1633_s15, %s2038_s15   ;;  %s1554_s14 = sphi %s1631_s14, %s2037_s14   ;;  %s1550_s13 = sphi %s1629_s13, %s2036_s13   ;;  %s1546_s12 = sphi %s1627_s12, %s2035_s12   ;;  %s1542_s11 = sphi %s1625_s11, %s2034_s11  }
   0xb   : > { %2017 = sst [smem:[#allocation15_spill]] %s1562_s16  ;;  %s1166_s17 = sadd.s32 4294967294, %s1562_s16  }
   0xc   : > { %p208_p0 = scmp.ne.s32.totalorder %s1546_s12, %s1542_s11  ;;  %p1659_p1 = scmp.eq.s32.totalorder %s1165_s0, 0 }
   0xd   : > { %p1663_p2 = scmp.eq.s32.totalorder %s1165_s0, 1  ;;  %p266_p3 = scmp.eq.s32.totalorder %s1166_s17, 1 }
   0xe   : > { %p1669_p4 = por %p1659_p1, %p208_p0  ;;  %p1167_p5 = scmp.ge.s32.totalorder %s1562_s16, 1 }
   0xf   : > { %p1674_p6 = por %p266_p3, %p208_p0  ;;  %p273_p7 = scmp.lt.s32.totalorder %s1562_s16, 3 }
  0x10   : > { %s2023_s3 = sld [smem:[#allocation19_spill]]  ;;  %s1564_s26 = smov [#allocation5]  }
  0x11   : > { %s2021_s21 = scalar_select %p1674_p6, 1, 0 }
  0x12   : > { %p1682_p8 = pnand %p1167_p5, %p273_p7  ;;  %s295_s27 = sshll.u32 %s1564_s26, 4  ;;  %s296_s27 = int_to_ptr.vmem [resolvable:$true] %s295_s27 }
  0x13   : > { %2022 = sst [smem:[#allocation16_spill]] %s2021_s21  ;;  %p1169_p11 = scmp.ge.s32.totalorder %s1562_s16, 2 }
  0x14   : > { %p1276_p9 = pneg %p1682_p8  ;;  %s1565_s28 = smov 64  }
  0x15   : > { %s1566_s29 = smov 4   ;;  %s39_s30 = sadd.s32 1, %s1558_s15 }
  0x16   : > { %s293_s24 = sshll.u32 %s2023_s3, 4  ;;  %p1277_p10 = pnand %p1276_p9, %p1659_p1  ;;  %s294_s24 = int_to_ptr.hbm [resolvable:$true] %s293_s24 }
  0x17   : > { %p41_p12 = scmp.ge.s32.totalorder %s39_s30, 2  ;;  %s195_s10 = sadd.s32 1, %s1550_s13 }
  0x18   : > { %1279 = dma.hbm_to_vmem [thread:$0]  (!%p1277_p10), %s294_s24, 256, %s296_s27, [#allocation6], %s1565_s28, %s1565_s28, %s1566_s29  }
  0x19   : > { %p202_p13 = scmp.ne.s32.totalorder %s1550_s13, %s1546_s12  ;;  %p203_p0 = scmp.eq.s32.totalorder %s1562_s16, 0 }
  0x1a   : > { %s2040_s30 = smov (%p41_p12, %s39_s30), 0  ;;  %p1289_p7 = scmp.lt.s32.totalorder %s1562_s16, 2 }
  0x1b   : > { %2025 = sst [smem:[#allocation17_spill]] %s2040_s30  ;;  %p1698_p3 = por %p203_p0, %p202_p13 }
  0x1c   : > { %p1704_p5 = por %p1663_p2, %p202_p13  ;;  %s190_s22 = ssub.s32 %s1558_s15, %s2040_s30 }
  0x1d   : > { %p193_p9 = scmp.eq.s32.totalorder %s190_s22, 0  ;;  %s318_s23 = sand.u32 1, %s1550_s13  }
  0x1e   : > { %s2027_s17 = scalar_select %p1704_p5, 1, 0 }
  0x1f   : > { %s1170_s24 = sshll.u32 %s318_s23, 5  ;;  %s1244_s27 = sshll.u32 %s1558_s15, 5 }
  0x20   : > { %2028 = sst [smem:[#allocation18_spill]] %s2027_s17  ;;  %s328_s3 = scalar_lea.hbm %s2005_s7, %s1244_s27 }
  0x21   : > { %s1713_s26 = scalar_select %p193_p9, %s1550_s13, %s195_s10  }
  0x22   : > { %s322_s21 = scalar_lea.vmem [#allocation8], %s1170_s24  ;;  %s329_s19 = sshll.u32 %s328_s3, 4  ;;  %s330_s19 = int_to_ptr.hbm [resolvable:$true] %s329_s19 }
  0x23   : > { %s331_s11 = sshll.u32 %s322_s21, 4  ;;  %p1281_p2 = pnand %p1289_p7, %p1698_p3  ;;  %s332_s11 = int_to_ptr.vmem [resolvable:$true] %s331_s11 }
  0x24   : > { %s319_s17 = scalar_lea.sflag [#allocation9], %s318_s23  ;;  %s1567_s30 = smov 128  }
  0x25   : > { %s1568_s16 = smov 8   ;;  %351 = sbr.rel (%p1682_p8) target bundleno = 1183 (0x49f), region = 56 }
  0x26   : > { %1283 = dma.hbm_to_vmem [thread:$0]  (!%p1281_p2), %s330_s19, 512, %s332_s11, %s319_s17, %s1567_s30, %s1567_s30, %s1568_s16  }
  0x2a   : > { %1529 = dma.done.wait (%p1659_p1), [#allocation6], 256  }
  0x2b   : > { %1531 = vsyncadd (%p1659_p1), [#allocation6], 4294967040  ;;  %s1728_s3 = sand.u32 1, %s1546_s12  }
  0x2c   : > { %s1175_s21 = sshll.u32 %s1728_s3, 5  ;;  %s359_s10 = scalar_lea.sflag [#allocation9], %s1728_s3 }
  0x2d   : > { %s362_s11 = scalar_lea.vmem [#allocation8], %s1175_s21 }
  0x2e   : > { %1533 = dma.done.wait (%p1669_p4), %s359_s10, 512  }
  0x2f   : > { %1535 = vsyncadd (%p1669_p4), %s359_s10, 4294966784  ;;  %p403_p8 = scmp.lt.s32.totalorder %s1554_s14, 1  ;;  %v1569_v0 = vmov 0   ;;  %v1743_v2 = vld [vmem:[%s362_s11 + $0x10] sm:$0xff]  ;;  %v1745_v3 = vld [vmem:[%s362_s11 + $0x18] sm:$0xff]  ;;  %vm436_vm0 = vcmask 261120   ;;  %v709_v42 = vlaneseq }
  0x30   : > { %1349 = vset.pattern.permute.xlu0 %v1569_v0  ;;  %1351 = vset.pattern.permute.xlu2 %v1569_v0  ;;  %v589_v4 = vpack.c.bf16 %v1745_v3, %v1743_v2  ;;  %v1749_v5 = vld [vmem:[%s362_s11] sm:$0xff]  ;;  %v1751_v6 = vld [vmem:[%s362_s11 + $0x8] sm:$0xff]  ;;  %v1248_v14 = vld [vmem:[#allocation5] sm:$0xff]  ;;  %vm656_vm1 = vcmask 1041408   ;;  %vm631_vm2 = vcmask 31744   ;;  %vm566_vm4 = vcmask 257024  }
  0x31   : > { %s404_s16 = scalar_select %p403_p8, %s1554_s14, 1  ;;  %v590_v8 = vld [vmem:[%s2002_s4] sm:$0xf]  ;;  %v588_v9 = vpack.c.bf16 %v1751_v6, %v1749_v5  ;;  %v462_v13 = vld [vmem:[%s2004_s6 + $0x18] sm:$0xff]  ;;  %v1249_v15 = vld [vmem:[#allocation5 + $0x8] sm:$0xff]  ;;  %v1787_v44 = vand.u32 127, %v709_v42 }
  0x32   : > { %606 = vmatpush.bf16.msra.mxu2 %v589_v4  ;;  %593 = vperm.xlu0 %1349, %v590_v8   ;;  %v417_v10 = vld [vmem:[%s2000_s2] sm:$0x3]  ;;  %v460_v30 = vld [vmem:[%s2004_s6 + $0x8] sm:$0xff]  ;;  %v461_v31 = vld [vmem:[%s2004_s6 + $0x10] sm:$0xff]  ;;  %s993_s20 = sld [smem:[#allocation4]]  ;;  %s402_s17 = scalar_lea.vmem [#allocation10], %s1175_s21 }
  0x33   : > { %s1245_s18 = sshll.u32 %s404_s16, 4  ;;  %v587_v11 = vld [vmem:[%s1999_s1] sm:$0x3]  ;;  %470 = vperm.xlu2 %1351, %v460_v30   ;;  %vm711_vm3 = vcmp.lt.s32.totalorder %v1787_v44, 64  ;;  %s1258_s22 = sshll.u32 %s1554_s14, 5 }
  0x34   : > { %s407_s0 = scalar_lea.vmem %s2006_s8, %s1245_s18  ;;  %v418_v12 = vld [vmem:[%s2003_s5] sm:$0xf]  ;;  %s1052_s28 = scalar_lea.hbm %s2007_s9, %s1258_s22 }
  0x35   : > { %v1247_v1 = vld [vmem:[%s407_s0 + $0x8] sm:$0xff]  ;;  %v1246_v7 = vld [vmem:[%s407_s0] sm:$0xff]  ;;  %s1053_s29 = sshll.u32 %s402_s17, 4  ;;  %s1055_s21 = sshll.u32 %s1052_s28, 4  ;;  %s1054_s29 = int_to_ptr.vmem [resolvable:$true] %s1053_s29  ;;  %s1056_s21 = int_to_ptr.hbm [resolvable:$true] %s1055_s21 }
  0x36   : > { %446 = vmatpush.bf16.msra.mxu1 %v1247_v1  ;;  %607 = vmatpush.bf16.msra.mxu2 %v588_v9  ;;  %v459_v32 = vld [vmem:[%s2004_s6] sm:$0xff]  ;;  %s1040_s19 = scalar_lea.sflag [#allocation7], %s1728_s3  ;;  %s1490_s10 = sshra.s32 %s1056_s21, 4  ;;  %s1491_s10 = int_to_ptr.hbm [resolvable:$true] %s1490_s10 }
  0x37   : > { %s1492_s14 = scalar_lea.hbm %s1491_s10, 32  ;;  %s1496_s18 = scalar_lea.hbm %s2007_s9, 64 }
  0x38   : > { %p1493_p1 = scmp.ne.s32.totalorder %s1491_s10, %s1492_s14  ;;  %p1497_p12 = scmp.lt.s32.totalorder %s1491_s10, %s2007_s9 }
  0x39   : > { %1198 = vmatmul.msk.bf16.vlgmr.msra.gmra.mxu2 %vm436_vm0, %v587_v11  ;;  %p1498_p13 = scmp.lt.s32.totalorder %s1496_s18, %s1492_s14 }
  0x3a   : > { %447 = vmatpush.bf16.msra.mxu1 %v1246_v7  ;;  %421 = vperm.xlu0 %1349, %v418_v12   ;;  %p1494_p4 = pnand %p1493_p1, %p1704_p5 }
  0x3b   : > { %475 = vperm.xlu2 %1351, %v461_v31   ;;  %p1499_p0 = por %p1498_p13, %p1497_p12 }
  0x3c   : > { %p1495_p10 = pneg %p1494_p4 }
  0x3d   : > { %1187 = vmatmul.msk.bf16.vlgmr.msra.gmra.mxu1 %vm436_vm0, %v417_v10 }
  0x3e   : > { %505 = vmatpush.bf16.msrb.mxu1 %v1247_v1  ;;  %p1500_p3 = pnand %p1499_p0, %p1495_p10 }
  0x42   : > { %506 = vmatpush.bf16.msrb.mxu1 %v1246_v7  ;;  %480 = vperm.xlu0 %1349, %v462_v13  }
  0x4d   : > { %1196 = vmatmul.msk.bf16.vlgmr.msrb.gmra.mxu1 %vm436_vm0, %v1248_v14 }
  0x5d   : > { %1197 = vmatmul.msk.bf16.gmra.mxu1 %vm436_vm0, %v1249_v15 }
  0x8d   : > { %v471_v53 = vpop.permute.xlu2 %470 }
  0x95   : > { %v476_v55 = vpop.permute.xlu2 %475 }
  0xa4   : > { %v594_v16 = vpop.permute.xlu0 %593 }
  0xac   : > { %v422_v17 = vpop.permute.xlu0 %421 }
  0xb4   : > { %v481_v59 = vpop.permute.xlu0 %480 }
  0xba   : > { %v449_v18 = vpop.f32.mrf.mxu1 }
  0xbb   : > { %v450_v19 = vadd.f32 %v449_v18, %v422_v17 }
  0xbc   : > { %v609_v21 = vpop.f32.mrf.mxu2 }
  0xbd   : > { %v453_v20 = vpack.c.bf16 %v450_v19, %v450_v19  ;;  %v610_v23 = vadd.f32 %v609_v21, %v594_v16 }
  0xbf   : > { %454 = vst [vmem:[#allocation2] sm:$0x3] %v453_v20  ;;  %v613_v24 = vpack.c.bf16 %v610_v23, %v610_v23 }
  0xc1   : > { %615 = vxpose.xlu1.c.b16.start.end [1/1] (short) %v613_v24, 128 }
  0xc2   : > { %v451_v22 = vpop.f32.mrf.mxu1 }
  0xc4   : > { %v611_v27 = vpop.f32.mrf.mxu2 }
  0xc6   : > { %v614_v25 = vld [vmem:[#allocation2] sm:$0x3] }
  0xc7   : > { %v658_v26 = vsel %vm656_vm1, %v614_v25, 0 }
  0xc8   : > { %667 = vmatpush.bf16.msra.mxu1 %v658_v26  ;;  %1259 = vmatpush.bf16.msra.mxu3 %v658_v26 }
  0xca   : > { %v508_v37 = vpop.f32.mrf.mxu1 }
  0xd2   : > { %v510_v39 = vpop.f32.mrf.mxu1 }
  0xd3   : > { %v511_v54 = vadd.f32 %v510_v39, %v471_v53 }
  0xda   : > { %v513_v40 = vpop.f32.mrf.mxu1 }
  0xdb   : > { %v514_v56 = vadd.f32 %v513_v40, %v476_v55 }
  0xe2   : > { %v515_v43 = vpop.f32.mrf.mxu1 }
  0xe3   : > { %v516_v60 = vadd.f32 %v515_v43, %v481_v59 }
 0x114   : > { %1350 = vset.pattern.permute.xlu1 %v1569_v0 }
 0x16d   : > { %v623_v28 = vpop.trf.xlu1 }
 0x16e   : > { %1199 = vmatmul.msk.bf16.vlgmr.msra.gmra.mxu1 %vm631_vm2, %v623_v28 }
 0x17d   : > { %v624_v29 = vpop.trf.xlu1 }
 0x17e   : > { %1200 = vmatmul.msk.bf16.gmra.mxu1 %vm631_vm2, %v624_v29 }
 0x18b   : > { %465 = vperm.xlu1 %1350, %v459_v32  }
 0x18d   : > { %v625_v33 = vpop.trf.xlu1 }
 0x18e   : > { %1201 = vmatmul.msk.bf16.vlgmr.msra.gmra.mxu3 %vm631_vm2, %v625_v33 }
 0x19d   : > { %v626_v34 = vpop.trf.xlu1 }
 0x19e   : > { %1202 = vmatmul.msk.bf16.gmra.mxu3 %vm631_vm2, %v626_v34 }
 0x1ad   : > { %v627_v35 = vpop.trf.xlu1 }
 0x1ae   : > { %1203 = vmatmul.msk.bf16.gmra.mxu3 %vm631_vm2, %v627_v35 }
 0x1bd   : > { %v628_v36 = vpop.trf.xlu1 }
 0x1be   : > { %1204 = vmatmul.msk.bf16.gmra.mxu3 %vm631_vm2, %v628_v36 }
 0x1cd   : > { %v629_v38 = vpop.trf.xlu1 }
 0x1ce   : > { %1205 = vmatmul.msk.bf16.gmra.mxu3 %vm631_vm2, %v629_v38 }
 0x1dd   : > { %v630_v41 = vpop.trf.xlu1 }
 0x1de   : > { %1206 = vmatmul.msk.bf16.gmra.mxu3 %vm631_vm2, %v630_v41 }
 0x1eb   : > { %v669_v45 = vpop.f32.mrf.mxu1 }
 0x1ec   : > { %v712_v46 = vsel %vm711_vm3, %v669_v45, -1e+30 }
 0x1ed   : > { %728 = vmax.xlane.f32.xlu0 %v712_v46 }
 0x1f3   : > { %v671_v47 = vpop.f32.mrf.mxu1 }
 0x1f4   : > { %v713_v48 = vsel %vm711_vm3, %v671_v47, -1e+30 }
 0x1f5   : > { %730 = vmax.xlane.f32.xlu0 %v713_v48 }
 0x1fb   : > { %v674_v49 = vpop.f32.mrf.mxu1 }
 0x1fc   : > { %v1796_v50 = vsel %vm711_vm3, %v674_v49, -1e+30 }
 0x1fd   : > { %v466_v51 = vpop.permute.xlu1 %465  ;;  %732 = vmax.xlane.f32.xlu0 %v1796_v50 }
 0x1fe   : > { %v509_v52 = vadd.f32 %v508_v37, %v466_v51 }
 0x200   : > { %518 = vxpose.xlu2.b32.start [1/4] (short) %v509_v52, 128 }
 0x208   : > { %519 = vxpose.xlu2.b32.cont [2/4] (short) %v511_v54, 128 }
 0x210   : > { %520 = vxpose.xlu2.b32.cont [3/4] (short) %v514_v56, 128 }
 0x211   : > { %v679_v57 = vpop.f32.mrf.mxu3 }
 0x212   : > { %v716_v58 = vsel %vm711_vm3, %v679_v57, -1e+30 }
 0x213   : > { %736 = vmax.xlane.f32.xlu0 %v716_v58 }
 0x218   : > { %521 = vxpose.xlu2.b32.end [4/4] (short) %v516_v60, 128 }
 0x219   : > { %v681_v61 = vpop.f32.mrf.mxu3 }
 0x21a   : > { %v717_v62 = vsel %vm711_vm3, %v681_v61, -1e+30 }
 0x21b   : > { %738 = vmax.xlane.f32.xlu0 %v717_v62 }
 0x221   : > { %v684_v63 = vpop.f32.mrf.mxu3 }
 0x222   : > { %v1805_v0 = vsel %vm711_vm3, %v684_v63, -1e+30 }
 0x223   : > { %740 = vmax.xlane.f32.xlu0 %v1805_v0 }
 0x229   : > { %v686_v1 = vpop.f32.mrf.mxu3 }
 0x22a   : > { %v1810_v4 = vsel %vm711_vm3, %v686_v1, -1e+30 }
 0x22b   : > { %742 = vmax.xlane.f32.xlu0 %v1810_v4 }
 0x231   : > { %v689_v7 = vpop.f32.mrf.mxu3 }
 0x232   : > { %v1815_v8 = vsel %vm711_vm3, %v689_v7, -1e+30 }
 0x233   : > { %744 = vmax.xlane.f32.xlu0 %v1815_v8 }
 0x239   : > { %v691_v9 = vpop.f32.mrf.mxu3 }
 0x23a   : > { %v1820_v10 = vsel %vm711_vm3, %v691_v9, -1e+30 }
 0x23b   : > { %746 = vmax.xlane.f32.xlu0 %v1820_v10 }
 0x241   : > { %v694_v11 = vpop.f32.mrf.mxu3 }
 0x242   : > { %v1825_v12 = vsel %vm711_vm3, %v694_v11, -1e+30 }
 0x243   : > { %748 = vmax.xlane.f32.xlu0 %v1825_v12 }
 0x249   : > { %v696_v13 = vpop.f32.mrf.mxu3 }
 0x24a   : > { %v1830_v14 = vsel %vm711_vm3, %v696_v13, -1e+30 }
 0x24b   : > { %750 = vmax.xlane.f32.xlu0 %v1830_v14 }
 0x251   : > { %v699_v15 = vpop.f32.mrf.mxu3 }
 0x252   : > { %v1835_v16 = vsel %vm711_vm3, %v699_v15, -1e+30 }
 0x253   : > { %752 = vmax.xlane.f32.xlu0 %v1835_v16 }
 0x259   : > { %v701_v17 = vpop.f32.mrf.mxu3 }
 0x25a   : > { %v1840_v18 = vsel %vm711_vm3, %v701_v17, -1e+30 }
 0x25b   : > { %754 = vmax.xlane.f32.xlu0 %v1840_v18 }
 0x260   : > { %v729_v19 = vpop.xlane.xlu0 %728 }
 0x261   : > { %v704_v20 = vpop.f32.mrf.mxu3  ;;  %v760_v22 = vsub.f32 %v712_v46, %v729_v19 }
 0x262   : > { %v1845_v21 = vsel %vm711_vm3, %v704_v20, -1e+30 }
 0x263   : > { %756 = vmax.xlane.f32.xlu0 %v1845_v21  ;;  %v776_v23 = vmul.f32 1.442695, %v760_v22 }
 0x265   : > { %1352 = vpow2.f32 %v776_v23 }
 0x268   : > { %v731_v24 = vpop.xlane.xlu0 %730 }
 0x269   : > { %v761_v25 = vsub.f32 %v713_v48, %v731_v24  ;;  %v706_v26 = vpop.f32.mrf.mxu3 }
 0x26a   : > { %v1850_v27 = vsel %vm711_vm3, %v706_v26, -1e+30 }
 0x26b   : > { %v778_v28 = vmul.f32 1.442695, %v761_v25  ;;  %758 = vmax.xlane.f32.xlu0 %v1850_v27  ;;  %v1853_v30 = vpop.eup %1352 }
 0x26d   : > { %1354 = vpow2.f32 %v778_v28 }
 0x270   : > { %v733_v29 = vpop.xlane.xlu0 %732 }
 0x271   : > { %v762_v32 = vsub.f32 %v1796_v50, %v733_v29 }
 0x273   : > { %v1855_v31 = vpop.eup %1354  ;;  %808 = vadd.xlane.f32.xlu0 %v1853_v30  ;;  %v780_v34 = vmul.f32 1.442695, %v762_v32 }
 0x274   : > { %v840_v33 = vpack.c.bf16 %v1855_v31, %v1853_v30 }
 0x275   : > { %1356 = vpow2.f32 %v780_v34 }
 0x27b   : > { %810 = vadd.xlane.f32.xlu0 %v1855_v31  ;;  %v1862_v35 = vpop.eup %1356 }
 0x283   : > { %812 = vadd.xlane.f32.xlu0 %v1862_v35 }
 0x286   : > { %v737_v36 = vpop.xlane.xlu0 %736 }
 0x287   : > { %v764_v37 = vsub.f32 %v716_v58, %v737_v36 }
 0x289   : > { %v784_v38 = vmul.f32 1.442695, %v764_v37 }
 0x28b   : > { %1358 = vpow2.f32 %v784_v38 }
 0x28e   : > { %v739_v39 = vpop.xlane.xlu0 %738 }
 0x28f   : > { %v765_v40 = vsub.f32 %v717_v62, %v739_v39 }
 0x291   : > { %v786_v41 = vmul.f32 1.442695, %v765_v40  ;;  %v1865_v43 = vpop.eup %1358 }
 0x293   : > { %1360 = vpow2.f32 %v786_v41 }
 0x296   : > { %v741_v42 = vpop.xlane.xlu0 %740 }
 0x297   : > { %v766_v47 = vsub.f32 %v1805_v0, %v741_v42 }
 0x299   : > { %v1867_v45 = vpop.eup %1360  ;;  %v534_v46 = vpop.trf.xlu2  ;;  %v788_v50 = vmul.f32 1.442695, %v766_v47 }
 0x29a   : > { %v550_v48 = vpack.c.bf16 %v534_v46, %v534_v46  ;;  %818 = vadd.xlane.f32.xlu1 %v1867_v45  ;;  %v842_v49 = vpack.c.bf16 %v1867_v45, %v1865_v43  ;;  %v676_v46 = vpop.f32.mrf.mxu1 }
 0x29b   : > { %1362 = vpow2.f32 %v788_v50 }
 0x29c   : > { %567 = vst.msk [vmem:[#allocation3] sm:$0xf] %vm566_vm4, %v550_v48 }
 0x29e   : > { %v743_v51 = vpop.xlane.xlu0 %742 }
 0x29f   : > { %v767_v52 = vsub.f32 %v1810_v4, %v743_v51 }
 0x2a1   : > { %v790_v53 = vmul.f32 1.442695, %v767_v52  ;;  %v535_v54 = vpop.trf.xlu2  ;;  %v1878_v57 = vpop.eup %1362 }
 0x2a2   : > { %v551_v55 = vpack.c.bf16 %v535_v54, %v535_v54 }
 0x2a3   : > { %1364 = vpow2.f32 %v790_v53 }
 0x2a4   : > { %568 = vst.msk [vmem:[#allocation3 + $0x4] sm:$0xf] %vm566_vm4, %v551_v55 }
 0x2a6   : > { %v1876_v56 = vpop.xlane.xlu0 %744 }
 0x2a9   : > { %v1880_v58 = vpop.eup %1364  ;;  %v536_v59 = vpop.trf.xlu2 }
 0x2aa   : > { %v552_v60 = vpack.c.bf16 %v536_v59, %v536_v59  ;;  %v843_v61 = vpack.c.bf16 %v1880_v58, %v1878_v57 }
 0x2ac   : > { %569 = vst.msk [vmem:[#allocation3 + $0x8] sm:$0xf] %vm566_vm4, %v552_v60 }
 0x2ae   : > { %v1885_v62 = vpop.xlane.xlu0 %746 }
 0x2b1   : > { %v537_v63 = vpop.trf.xlu2 }
 0x2b2   : > { %v553_v0 = vpack.c.bf16 %v537_v63, %v537_v63 }
 0x2b4   : > { %570 = vst.msk [vmem:[#allocation3 + $0xc] sm:$0xf] %vm566_vm4, %v553_v0 }
 0x2b6   : > { %v1888_v1 = vpop.xlane.xlu0 %748 }
 0x2b9   : > { %v538_v4 = vpop.trf.xlu2 }
 0x2ba   : > { %v554_v7 = vpack.c.bf16 %v538_v4, %v538_v4 }
 0x2bc   : > { %571 = vst.msk [vmem:[#allocation3 + $0x10] sm:$0xf] %vm566_vm4, %v554_v7 }
 0x2be   : > { %v751_v9 = vpop.xlane.xlu0 %750 }
 0x2bf   : > { %v771_v11 = vsub.f32 %v1830_v14, %v751_v9 }
 0x2c1   : > { %v798_v13 = vmul.f32 1.442695, %v771_v11  ;;  %v539_v15 = vpop.trf.xlu2 }
 0x2c2   : > { %v555_v17 = vpack.c.bf16 %v539_v15, %v539_v15  ;;  %v769_v15 = vsub.f32 %v1820_v10, %v1885_v62  ;;  %v1250_v10 = vld [vmem:[#allocation3] sm:$0xff] }
 0x2c3   : > { %1366 = vpow2.f32 %v798_v13 }
 0x2c4   : > { %572 = vst.msk [vmem:[#allocation3 + $0x14] sm:$0xf] %vm566_vm4, %v555_v17  ;;  %v768_v17 = vsub.f32 %v1815_v8, %v1876_v56  ;;  %v770_v8 = vsub.f32 %v1825_v12, %v1888_v1 }
 0x2c6   : > { %v1893_v19 = vpop.xlane.xlu0 %752  ;;  %v796_v56 = vmul.f32 1.442695, %v770_v8 }
 0x2c9   : > { %v1895_v20 = vpop.eup %1366  ;;  %v540_v22 = vpop.trf.xlu2 }
 0x2ca   : > { %v556_v23 = vpack.c.bf16 %v540_v22, %v540_v22  ;;  %830 = vadd.xlane.f32.xlu1 %v1895_v20 }
 0x2cc   : > { %573 = vst.msk [vmem:[#allocation3 + $0x18] sm:$0xf] %vm566_vm4, %v556_v23  ;;  %v794_v23 = vmul.f32 1.442695, %v769_v15 }
 0x2ce   : > { %v755_v24 = vpop.xlane.xlu0 %754 }
 0x2cf   : > { %v773_v25 = vsub.f32 %v1840_v18, %v755_v24  ;;  %v792_v24 = vmul.f32 1.442695, %v768_v17 }
 0x2d1   : > { %v802_v14 = vmul.f32 1.442695, %v773_v25  ;;  %v541_v26 = vpop.trf.xlu2  ;;  %v1252_v25 = vld [vmem:[#allocation3 + $0x10] sm:$0xff] }
 0x2d2   : > { %v557_v28 = vpack.c.bf16 %v541_v26, %v541_v26 }
 0x2d3   : > { %1368 = vpow2.f32 %v802_v14  ;;  %v1251_v14 = vld [vmem:[#allocation3 + $0x8] sm:$0xff] }
 0x2d4   : > { %574 = vst.msk [vmem:[#allocation3 + $0x1c] sm:$0xf] %vm566_vm4, %v557_v28 }
 0x2d6   : > { %v757_v29 = vpop.xlane.xlu0 %756 }
 0x2d7   : > { %v774_v36 = vsub.f32 %v1845_v21, %v757_v29  ;;  %v1912_v21 = vsel %vm711_vm3, %v676_v46, -1e+30 }
 0x2d9   : > { %v1901_v32 = vpop.eup %1368  ;;  %v542_v34 = vpop.trf.xlu2  ;;  %v804_v38 = vmul.f32 1.442695, %v774_v36  ;;  %v772_v36 = vsub.f32 %v1835_v16, %v1893_v19 }
 0x2da   : > { %v558_v37 = vpack.c.bf16 %v542_v34, %v542_v34  ;;  %834 = vadd.xlane.f32.xlu1 %v1901_v32 }
 0x2db   : > { %1370 = vpow2.f32 %v804_v38  ;;  %v1253_v22 = vld [vmem:[#allocation3 + $0x18] sm:$0xff] }
 0x2dc   : > { %575 = vst.msk [vmem:[#allocation3 + $0x20] sm:$0xf] %vm566_vm4, %v558_v37  ;;  %v800_v37 = vmul.f32 1.442695, %v772_v36 }
 0x2de   : > { %v759_v39 = vpop.xlane.xlu0 %758 }
 0x2df   : > { %v775_v18 = vsub.f32 %v1850_v27, %v759_v39 }
 0x2e1   : > { %v806_v40 = vmul.f32 1.442695, %v775_v18  ;;  %v543_v41 = vpop.trf.xlu2  ;;  %v1908_v47 = vpop.eup %1370 }
 0x2e2   : > { %v559_v42 = vpack.c.bf16 %v543_v41, %v543_v41 }
 0x2e3   : > { %1372 = vpow2.f32 %v806_v40 }
 0x2e4   : > { %576 = vst.msk [vmem:[#allocation3 + $0x24] sm:$0xf] %vm566_vm4, %v559_v42  ;;  %1374 = vpow2.f32 %v794_v23 }
 0x2e5   : > { %1376 = vpow2.f32 %v792_v24 }
 0x2e6   : > { %1378 = vpow2.f32 %v796_v56  ;;  %v809_v16 = vpop.xlane.xlu0 %808 }
 0x2e7   : > { %1380 = vpow2.f32 %v800_v37 }
 0x2e9   : > { %v1914_v48 = vpop.eup %1372  ;;  %v544_v50 = vpop.trf.xlu2  ;;  %734 = vmax.xlane.f32.xlu2 %v1912_v21 }
 0x2ea   : > { %v560_v27 = vpack.c.bf16 %v544_v50, %v544_v50  ;;  %838 = vadd.xlane.f32.xlu1 %v1914_v48  ;;  %v847_v51 = vpack.c.bf16 %v1914_v48, %v1908_v47  ;;  %v1375_v26 = vpop.eup %1374 }
 0x2eb   : > { %v1254_v13 = vld [vmem:[#allocation3 + $0x20] sm:$0xff]  ;;  %v1377_v62 = vpop.eup %1376 }
 0x2ec   : > { %577 = vst.msk [vmem:[#allocation3 + $0x28] sm:$0xf] %vm566_vm4, %v560_v27  ;;  %v844_v28 = vpack.c.bf16 %v1375_v26, %v1377_v62  ;;  %v1379_v29 = vpop.eup %1378 }
 0x2ed   : > { %v845_v34 = vpack.c.bf16 %v1895_v20, %v1379_v29  ;;  %v1381_v38 = vpop.eup %1380 }
 0x2ee   : > { %v846_v39 = vpack.c.bf16 %v1901_v32, %v1381_v38  ;;  %v811_v19 = vpop.xlane.xlu0 %810 }
 0x2f1   : > { %v545_v52 = vpop.trf.xlu2 }
 0x2f2   : > { %v561_v53 = vpack.c.bf16 %v545_v52, %v545_v52 }
 0x2f4   : > { %578 = vst.msk [vmem:[#allocation3 + $0x2c] sm:$0xf] %vm566_vm4, %v561_v53 }
 0x2f6   : > { %v813_v18 = vpop.xlane.xlu0 %812 }
 0x2f9   : > { %v546_v44 = vpop.trf.xlu2 }
 0x2fa   : > { %v562_v54 = vpack.c.bf16 %v546_v44, %v546_v44 }
 0x2fb   : > { %v1255_v11 = vld [vmem:[#allocation3 + $0x28] sm:$0xff] }
 0x2fc   : > { %579 = vst.msk [vmem:[#allocation3 + $0x30] sm:$0xf] %vm566_vm4, %v562_v54 }
 0x301   : > { %v547_v55 = vpop.trf.xlu2 }
 0x302   : > { %v563_v59 = vpack.c.bf16 %v547_v55, %v547_v55 }
 0x304   : > { %580 = vst.msk [vmem:[#allocation3 + $0x34] sm:$0xf] %vm566_vm4, %v563_v59 }
 0x309   : > { %v548_v60 = vpop.trf.xlu2 }
 0x30a   : > { %v564_v63 = vpack.c.bf16 %v548_v60, %v548_v60 }
 0x30b   : > { %v1256_v9 = vld [vmem:[#allocation3 + $0x30] sm:$0xff] }
 0x30c   : > { %581 = vst.msk [vmem:[#allocation3 + $0x38] sm:$0xf] %vm566_vm4, %v564_v63 }
 0x30d   : > { %v819_v48 = vpop.xlane.xlu1 %818 }
 0x311   : > { %v549_v0 = vpop.trf.xlu2 }
 0x312   : > { %v565_v4 = vpack.c.bf16 %v549_v0, %v549_v0 }
 0x314   : > { %582 = vst.msk [vmem:[#allocation3 + $0x3c] sm:$0xf] %vm566_vm4, %v565_v4 }
 0x31b   : > { %v1257_v7 = vld [vmem:[#allocation3 + $0x38] sm:$0xff] }
 0x31c   : > { %912 = vmatpush.bf16.msra.mxu0 %v1257_v7  ;;  %1260 = vmatpush.bf16.msrb.mxu2 %v1257_v7 }
 0x320   : > { %913 = vmatpush.bf16.msra.mxu0 %v1256_v9  ;;  %1261 = vmatpush.bf16.msrb.mxu2 %v1256_v9 }
 0x324   : > { %914 = vmatpush.bf16.msra.mxu0 %v1255_v11  ;;  %1262 = vmatpush.bf16.msrb.mxu2 %v1255_v11 }
 0x328   : > { %915 = vmatpush.bf16.msra.mxu0 %v1254_v13  ;;  %1263 = vmatpush.bf16.msrb.mxu2 %v1254_v13 }
 0x32c   : > { %916 = vmatpush.bf16.msra.mxu0 %v1253_v22  ;;  %1264 = vmatpush.bf16.msrb.mxu2 %v1253_v22 }
 0x330   : > { %917 = vmatpush.bf16.msra.mxu0 %v1252_v25  ;;  %1265 = vmatpush.bf16.msrb.mxu2 %v1252_v25 }
 0x334   : > { %918 = vmatpush.bf16.msra.mxu0 %v1251_v14  ;;  %1266 = vmatpush.bf16.msrb.mxu2 %v1251_v14 }
 0x338   : > { %919 = vmatpush.bf16.msra.mxu0 %v1250_v10  ;;  %1267 = vmatpush.bf16.msrb.mxu2 %v1250_v10 }
 0x33b   : > { %920 = vmatmul.bf16.vlgmr.msra.gmra.mxu0 %v840_v33  ;;  %940 = vmatmul.bf16.vlgmr.msrb.gmra.mxu2 %v844_v28 }
 0x33d   : > { %v831_v10 = vpop.xlane.xlu1 %830 }
 0x34b   : > { %945 = vmatmul.bf16.gmra.mxu2 %v845_v34 }
 0x34d   : > { %v835_v36 = vpop.xlane.xlu1 %834 }
 0x35b   : > { %950 = vmatmul.bf16.gmra.mxu2 %v846_v39 }
 0x35c   : > { %v735_v12 = vpop.xlane.xlu2 %734 }
 0x35d   : > { %v763_v30 = vsub.f32 %v1912_v21, %v735_v12 }
 0x35f   : > { %v782_v31 = vmul.f32 1.442695, %v763_v30 }
 0x361   : > { %1382 = vpow2.f32 %v782_v31 }
 0x362   : > { %1384 = vrcp.f32 %v809_v16 }
 0x363   : > { %1386 = vrcp.f32 %v811_v19 }
 0x364   : > { %1388 = vrcp.f32 %v813_v18 }
 0x367   : > { %v1383_v33 = vpop.eup %1382 }
 0x368   : > { %814 = vadd.xlane.f32.xlu0 %v1383_v33  ;;  %v841_v1 = vpack.c.bf16 %v1383_v33, %v1862_v35  ;;  %v1385_v20 = vpop.eup %1384 }
 0x369   : > { %v1387_v45 = vpop.eup %1386 }
 0x36a   : > { %925 = vmatmul.bf16.gmra.mxu0 %v841_v1  ;;  %v839_v1 = vpop.xlane.xlu1 %838 }
 0x36b   : > { %955 = vmatmul.bf16.gmra.mxu2 %v847_v51 }
 0x370   : > { %816 = vadd.xlane.f32.xlu0 %v1865_v43 }
 0x378   : > { %820 = vadd.xlane.f32.xlu0 %v1878_v57 }
 0x37a   : > { %930 = vmatmul.bf16.gmra.mxu0 %v842_v49 }
 0x380   : > { %822 = vadd.xlane.f32.xlu0 %v1880_v58  ;;  %v1389_v58 = vpop.eup %1388 }
 0x388   : > { %824 = vadd.xlane.f32.xlu0 %v1377_v62 }
 0x38a   : > { %935 = vmatmul.bf16.gmra.mxu0 %v843_v61 }
 0x390   : > { %826 = vadd.xlane.f32.xlu0 %v1375_v26 }
 0x398   : > { %828 = vadd.xlane.f32.xlu0 %v1379_v29 }
 0x3a0   : > { %832 = vadd.xlane.f32.xlu0 %v1381_v38 }
 0x3a8   : > { %836 = vadd.xlane.f32.xlu0 %v1908_v47 }
 0x3b8   : > { %v921_v35 = vpop.f32.mrf.mxu0 }
 0x3b9   : > { %v977_v32 = vmul.f32 %v1385_v20, %v921_v35 }
 0x3be   : > { %v941_v59 = vpop.f32.mrf.mxu2 }
 0x3c0   : > { %v923_v43 = vpop.f32.mrf.mxu0 }
 0x3c1   : > { %v978_v49 = vmul.f32 %v1387_v45, %v923_v43 }
 0x3c6   : > { %v943_v11 = vpop.f32.mrf.mxu2 }
 0x3ce   : > { %v946_v22 = vpop.f32.mrf.mxu2 }
 0x3d1   : > { %994 = vxpose.xlu0.b32.start [1/16] (narrow) %v977_v32, 32  ;;  %v1026_v32 = vstv %s993_s20 }
 0x3d6   : > { %v948_v26 = vpop.f32.mrf.mxu2 }
 0x3d9   : > { %995 = vxpose.xlu0.b32.cont [2/16] (narrow) %v978_v49, 32 }
 0x3db   : > { %v815_v57 = vpop.xlane.xlu0 %814 }
 0x3dc   : > { %1390 = vrcp.f32 %v815_v57 }
 0x3de   : > { %v951_v56 = vpop.f32.mrf.mxu2 }
 0x3e2   : > { %v1391_v42 = vpop.eup %1390 }
 0x3e3   : > { %v817_v41 = vpop.xlane.xlu0 %816 }
 0x3e4   : > { %1392 = vrcp.f32 %v817_v41 }
 0x3e5   : > { %1394 = vrcp.f32 %v819_v48 }
 0x3e6   : > { %v953_v38 = vpop.f32.mrf.mxu2 }
 0x3e7   : > { %v926_v61 = vpop.f32.mrf.mxu0 }
 0x3e8   : > { %v979_v40 = vmul.f32 %v1389_v58, %v926_v61 }
 0x3ea   : > { %996 = vxpose.xlu0.b32.cont [3/16] (narrow) %v979_v40, 32  ;;  %v1393_v50 = vpop.eup %1392 }
 0x3eb   : > { %v821_v21 = vpop.xlane.xlu0 %820  ;;  %v1395_v53 = vpop.eup %1394 }
 0x3ec   : > { %1396 = vrcp.f32 %v821_v21 }
 0x3ee   : > { %v956_v31 = vpop.f32.mrf.mxu2 }
 0x3ef   : > { %v928_v46 = vpop.f32.mrf.mxu0 }
 0x3f0   : > { %v980_v47 = vmul.f32 %v1391_v42, %v928_v46 }
 0x3f2   : > { %997 = vxpose.xlu0.b32.cont [4/16] (narrow) %v980_v47, 32  ;;  %v1397_v55 = vpop.eup %1396 }
 0x3f3   : > { %v823_v52 = vpop.xlane.xlu0 %822 }
 0x3f4   : > { %1398 = vrcp.f32 %v823_v52 }
 0x3f6   : > { %v958_v35 = vpop.f32.mrf.mxu2 }
 0x3f7   : > { %v931_v27 = vpop.f32.mrf.mxu0 }
 0x3f8   : > { %v981_v51 = vmul.f32 %v1393_v50, %v931_v27 }
 0x3fa   : > { %998 = vxpose.xlu0.b32.cont [5/16] (narrow) %v981_v51, 32  ;;  %v1399_v4 = vpop.eup %1398 }
 0x3fb   : > { %v825_v63 = vpop.xlane.xlu0 %824 }
 0x3fc   : > { %1400 = vrcp.f32 %v825_v63 }
 0x3ff   : > { %v933_v44 = vpop.f32.mrf.mxu0 }
 0x400   : > { %v982_v54 = vmul.f32 %v1395_v53, %v933_v44 }
 0x402   : > { %999 = vxpose.xlu0.b32.cont [6/16] (narrow) %v982_v54, 32  ;;  %v1401_v15 = vpop.eup %1400 }
 0x403   : > { %v827_v13 = vpop.xlane.xlu0 %826  ;;  %v985_v17 = vmul.f32 %v1401_v15, %v941_v59 }
 0x404   : > { %1402 = vrcp.f32 %v827_v13 }
 0x407   : > { %v936_v60 = vpop.f32.mrf.mxu0 }
 0x408   : > { %v983_v0 = vmul.f32 %v1397_v55, %v936_v60 }
 0x40a   : > { %1000 = vxpose.xlu0.b32.cont [7/16] (narrow) %v983_v0, 32  ;;  %v1403_v24 = vpop.eup %1402 }
 0x40b   : > { %v829_v23 = vpop.xlane.xlu0 %828  ;;  %v986_v25 = vmul.f32 %v1403_v24, %v943_v11 }
 0x40c   : > { %1404 = vrcp.f32 %v829_v23 }
 0x40d   : > { %1406 = vrcp.f32 %v831_v10 }
 0x40f   : > { %v938_v7 = vpop.f32.mrf.mxu0 }
 0x410   : > { %v984_v9 = vmul.f32 %v1399_v4, %v938_v7 }
 0x412   : > { %1001 = vxpose.xlu0.b32.cont [8/16] (narrow) %v984_v9, 32  ;;  %v1405_v14 = vpop.eup %1404 }
 0x413   : > { %v987_v62 = vmul.f32 %v1405_v14, %v946_v22  ;;  %v833_v28 = vpop.xlane.xlu0 %832  ;;  %v1407_v8 = vpop.eup %1406 }
 0x414   : > { %1408 = vrcp.f32 %v833_v28  ;;  %v988_v29 = vmul.f32 %v1407_v8, %v948_v26 }
 0x415   : > { %1410 = vrcp.f32 %v835_v36 }
 0x41a   : > { %1002 = vxpose.xlu0.b32.cont [9/16] (narrow) %v985_v17, 32  ;;  %v1409_v34 = vpop.eup %1408 }
 0x41b   : > { %v989_v37 = vmul.f32 %v1409_v34, %v951_v56  ;;  %v837_v39 = vpop.xlane.xlu0 %836  ;;  %v1411_v12 = vpop.eup %1410 }
 0x41c   : > { %1412 = vrcp.f32 %v837_v39  ;;  %v990_v30 = vmul.f32 %v1411_v12, %v953_v38 }
 0x41d   : > { %1414 = vrcp.f32 %v839_v1 }
 0x422   : > { %1003 = vxpose.xlu0.b32.cont [10/16] (narrow) %v986_v25, 32  ;;  %v1413_v33 = vpop.eup %1412 }
 0x423   : > { %v991_v16 = vmul.f32 %v1413_v33, %v956_v31  ;;  %v1415_v19 = vpop.eup %1414 }
 0x424   : > { %v992_v20 = vmul.f32 %v1415_v19, %v958_v35 }
 0x42a   : > { %1004 = vxpose.xlu0.b32.cont [11/16] (narrow) %v987_v62, 32 }
 0x432   : > { %1005 = vxpose.xlu0.b32.cont [12/16] (narrow) %v988_v29, 32 }
 0x43a   : > { %1006 = vxpose.xlu0.b32.cont [13/16] (narrow) %v989_v37, 32 }
 0x442   : > { %1007 = vxpose.xlu0.b32.cont [14/16] (narrow) %v990_v30, 32 }
 0x44a   : > { %1008 = vxpose.xlu0.b32.cont [15/16] (narrow) %v991_v16, 32 }
 0x452   : > { %1009 = vxpose.xlu0.b32.end [16/16] (narrow) %v992_v20, 32 }
 0x47e   : > { %v1010_v43 = vpop.trf.xlu0 }
 0x47f   : > { %v1027_v45 = vmul.f32 %v1026_v32, %v1010_v43 }
 0x481   : > { %v1031_v49 = vadd.f32 %v1027_v45, %v1749_v5 }
 0x483   : > { %1035 = vst [vmem:[%s402_s17] sm:$0xff] %v1031_v49 }
 0x486   : > { %v1011_v18 = vpop.trf.xlu0 }
 0x487   : > { %v1028_v57 = vmul.f32 %v1026_v32, %v1011_v18 }
 0x489   : > { %v1032_v58 = vadd.f32 %v1028_v57, %v1751_v6 }
 0x48b   : > { %1036 = vst [vmem:[%s402_s17 + $0x8] sm:$0xff] %v1032_v58 }
 0x48e   : > { %v1012_v61 = vpop.trf.xlu0 }
 0x48f   : > { %v1029_v40 = vmul.f32 %v1026_v32, %v1012_v61 }
 0x491   : > { %v1033_v41 = vadd.f32 %v1029_v40, %v1743_v2 }
 0x493   : > { %1037 = vst [vmem:[%s402_s17 + $0x10] sm:$0xff] %v1033_v41 }
 0x496   : > { %v1013_v5 = vpop.trf.xlu0 }
 0x497   : > { %v1030_v42 = vmul.f32 %v1026_v32, %v1013_v5 }
 0x499   : > { %v1034_v6 = vadd.f32 %v1030_v42, %v1745_v3 }
 0x49b   : > { %1038 = vst [vmem:[%s402_s17 + $0x18] sm:$0xff] %v1034_v6 }
 0x49c   : > { %1503 = shalt.err (!%p1500_p3)
}
 0x49d   : > { %s1570_s3 = smov 128   ;;  %s1571_s0 = smov 8  }
 0x49e   : > { %1274 = dma.vmem_to_hbm [thread:$0]  (%p1704_p5), %s1054_s29, 512, %s1056_s21, %s1040_s19, %s1570_s3, %s1570_s3, %s1571_s0  }
 0x49f PF: > { %s2030_s20 = sld [smem:[#allocation14_spill]]  ;;  %p1285_p7 = pnand %p1169_p11, %p1674_p6 }
 0x4a0   : > { %s2032_s22 = sld [smem:[#allocation15_spill]] }
 0x4a1   : > { %p1286_p9 = pneg %p1285_p7 }
 0x4a5   : > { %s1070_s23 = sand.u32 1, %s2030_s20  }
 0x4a6   : > { %s1071_s24 = scalar_lea.sflag [#allocation7], %s1070_s23 }
 0x4a7   : > { %1537 = dma.done.wait (%p1286_p9), %s1071_s24, 512  }
 0x4a8   : > { %1539 = vsyncadd (%p1286_p9), %s1071_s24, 4294966784  ;;  %s27_s16 = sadd.s32 1, %s2032_s22   ;;  %s2033_s27 = sld [smem:[#allocation17_spill]] }
 0x4a9   : > { %p24_p2 = scmp.ge.s32.totalorder %s27_s16, 4   ;;  %s2034_s11 = smov %s1546_s12 }
 0x4aa   : > { %s2035_s12 = smov %s1550_s13  ;;  %s2036_s13 = smov %s1713_s26 }
 0x4ab   : > { %s2037_s14 = smov %s1558_s15  ;;  %26 = sbr.rel (!%p24_p2) target bundleno = 10 (0xa), region = 113 }
 0x4ae   : > { %s2038_s15 = smov %s2033_s27 }
 0x4b0   :  { %1077 = vsyncpa [#allocation6], 1 }
 0x4b1   :  { %1079 = vsyncpa [#allocation6 + $0x1], 1 }
 0x4b2   :  { %1080 = vsyncpa [#allocation9], 1 }
 0x4b3   :  { %1082 = vsyncpa [#allocation9 + $0x1], 1 }
 0x4b4   :  { %1083 = vsyncpa [#allocation7], 1 }
 0x4b5   :  { %1085 = vsyncpa [#allocation7 + $0x1], 1 }

</bundles_post_ra>
